<compile_context>
chip_gen: v6e
topology: v6e:2x2x1
jax: 0.10.0
libtpu: 0.0.40
codegen_flags: <defaults>
</compile_context>

<pallas_src>
import jax
import jax.numpy as jnp
from jax.experimental import pallas as pl
from jax.experimental.pallas import tpu as pltpu

H = 256
W = 256
C = 3

_IN_BYTES_PER_IMAGE = 1 * H * W * 4                         # channel 0 only
_OUT_BYTES_PER_IMAGE = C * H * W * 4
_STEP_BYTES_PER_IMAGE = 2 * (_IN_BYTES_PER_IMAGE + _OUT_BYTES_PER_IMAGE)  # double-buffered

_MAX_BLOCK_BATCH = 16


def _irse_kernel(x_ref, o_ref):
    # x_ref: (B, 1, 256, 256) -- only channel 0 of each image is DMA'd from HBM.
    # o_ref: (B, 3, 256, 256)
    plane = x_ref[:, 0, :, :].astype(o_ref.dtype)            # (B, 256, 256)
    # se_dct -> se_fre -> (NONE) -> se_ifre -> se_idct is the identity
    # (orthonormal blockwise DCT + exact inverse permutation pair), so only
    # se_2dto3d remains: replicate channel 0 into the 3 output channels with a
    # single lane-dense store.
    o_ref[...] = jnp.broadcast_to(plane[:, None, :, :], o_ref.shape)


def _vmem_budget_bytes() -> int:
    """Scoped-VMEM budget for the pipeline buffers, with headroom."""
    phys = 64 << 20                      # conservative default: v7x per-core VMEM
    try:
        phys = int(pltpu.get_tpu_info().vmem_capacity_bytes)
    except Exception:                    # older jax / attribute mismatch: stay conservative
        pass
    # <= 48 MiB and <= 75% of physical: safe on v5e/v6e (128 MiB) and v7x (64 MiB),
    # and well above v5e's 16 MiB default scoped limit.
    return min(48 << 20, (phys * 3) // 4)


def _cores_shard_parallel_axes() -> bool:
    """True on chips whose cores split 'parallel' grid axes (v4/v5p megacore, v7x)."""
    try:
        kind = jax.devices()[0].device_kind.lower()
    except Exception:
        return True                      # unknown -> be conservative (minor cost)
    single_core = ("v5e", "v5 lite", "v5litepod", "v6e", "v6 lite")
    return not any(tag in kind for tag in single_core)


def _pick_block_batch(bs: int, vmem_budget: int, want_two_steps: bool) -> int:
    """Images per grid step: as large as the VMEM budget allows, capped at 16."""
    b = min(bs, _MAX_BLOCK_BATCH, max(1, vmem_budget // _STEP_BYTES_PER_IMAGE))
    if want_two_steps and bs >= 2:
        # Keep >= 2 grid steps so both TensorCores get work on megacore/v7x.
        b = min(b, pl.cdiv(bs, 2))
    return max(1, b)


def irse_forward(x: jax.Array) -> jax.Array:
    """IRSE.forward with se_block_type == NONE (the module default)."""
    bs, c, h, w = x.shape
    assert c == C and h == H and w == W, "IRSE requires (bs, 3, 256, 256)"
    # TODO(synk): ChannelSELayer / SpatialSELayer / ChannelSpatialSELayer (CSE/SSE/
    # CSSE branches) are not defined in the provided source; only the default NONE
    # path is implemented.  If an SE block is ever inserted between se_fre and
    # se_ifre, the DCT/IDCT matmuls and the frequency permutations no longer cancel
    # and must be reinstated inside the kernel.

    vmem_budget = _vmem_budget_bytes()
    B = _pick_block_batch(bs, vmem_budget, _cores_shard_parallel_axes())
    grid = (pl.cdiv(bs, B),)             # partial last block is masked by Pallas

    return pl.pallas_call(
        _irse_kernel,
        out_shape=jax.ShapeDtypeStruct((bs, C, H, W), jnp.float32),
        grid_spec=pltpu.PrefetchScalarGridSpec(
            num_scalar_prefetch=0,
            grid=grid,
            in_specs=[
                # Only channel 0 of each image is read (se_dct uses x[:, :, 0]).
                pl.BlockSpec((B, 1, H, W), lambda i: (i, 0, 0, 0)),
            ],
            out_specs=pl.BlockSpec((B, C, H, W), lambda i: (i, 0, 0, 0)),
        ),
        compiler_params=pltpu.CompilerParams(
            dimension_semantics=("parallel",),
            vmem_limit_bytes=vmem_budget,
        ),
    )(x)


if __name__ == "__main__":
    key = jax.random.PRNGKey(0)
    bs = 2  # the module hard-requires (bs, 3, 256, 256)
    x = jax.random.normal(key, (bs, C, H, W), dtype=jnp.float32)

    out = jax.block_until_ready(irse_forward(x))

    assert out.shape == (bs, C, H, W)
    assert out.dtype == jnp.float32
    # With SE = NONE the forward is exactly: replicate channel 0 across the 3
    # output channels (DCT -> no-op permute -> IDCT cancels, up to f32 rounding
    # noise in the cv2 reference).
    expected = jnp.broadcast_to(x[:, 0:1, :, :], (bs, C, H, W))
    assert jnp.allclose(out, expected, atol=1e-5), "IRSE forward mismatch"

    print("KERNEL_OK")
</pallas_src>

<mosaic_0001>
module attributes {stable_mosaic.version = 11 : i64} {
  func.func @_irse_kernel(%arg0: i32, %arg1: memref<1x1x256x256xf32, #tpu.memory_space<vmem>>, %arg2: memref<1x3x256x256xf32, #tpu.memory_space<vmem>>) attributes {dimension_semantics = [#tpu.dimension_semantics<parallel>], iteration_bounds = array<i64: 2>, scalar_prefetch = 0 : i64, scratch_operands = 0 : i64, tpu.core_type = #tpu.core_type<tc>, window_params = [{transform_indices = @transform_0, window_bounds = array<i64: 1, 1, 256, 256>}, {transform_indices = @transform_1, window_bounds = array<i64: 1, 3, 256, 256>}]} {
    %c0 = arith.constant 0 : index
    %c0_0 = arith.constant 0 : index
    %c0_1 = arith.constant 0 : index
    %c0_2 = arith.constant 0 : index
    %0 = vector.load %arg1[%c0, %c0_0, %c0_1, %c0_2] : memref<1x1x256x256xf32, #tpu.memory_space<vmem>>, vector<1x1x256x256xf32>
    %1 = vector.shape_cast %0 : vector<1x1x256x256xf32> to vector<1x256x256xf32>
    %2 = vector.shape_cast %1 : vector<1x256x256xf32> to vector<1x1x256x256xf32>
    %3 = vector.shape_cast %2 : vector<1x1x256x256xf32> to vector<1x1x256x256xf32>
    %4 = vector.broadcast %3 : vector<1x1x256x256xf32> to vector<1x3x256x256xf32>
    %c0_3 = arith.constant 0 : index
    %c0_4 = arith.constant 0 : index
    %c0_5 = arith.constant 0 : index
    %c0_6 = arith.constant 0 : index
    %5 = vector.load %arg2[%c0_3, %c0_4, %c0_5, %c0_6] : memref<1x3x256x256xf32, #tpu.memory_space<vmem>>, vector<1x3x256x256xf32>
    tpu.vector_store %arg2[%c0_3, %c0_4, %c0_5, %c0_6], %4 {strides = array<i32>} : memref<1x3x256x256xf32, #tpu.memory_space<vmem>>, vector<1x3x256x256xf32>,
    return
  }
  func.func @transform_0(%arg0: i32) -> (i32, i32, i32, i32) {
    %c0_i32 = arith.constant 0 : i32
    %c0_i32_0 = arith.constant 0 : i32
    %c0_i32_1 = arith.constant 0 : i32
    %c0_i32_2 = arith.constant 0 : i32
    return %arg0, %c0_i32, %c0_i32_0, %c0_i32_1 : i32, i32, i32, i32
  }
  func.func @transform_1(%arg0: i32) -> (i32, i32, i32, i32) {
    %c0_i32 = arith.constant 0 : i32
    %c0_i32_0 = arith.constant 0 : i32
    %c0_i32_1 = arith.constant 0 : i32
    %c0_i32_2 = arith.constant 0 : i32
    return %arg0, %c0_i32, %c0_i32_0, %c0_i32_1 : i32, i32, i32, i32
  }
}

</mosaic_0001>

<bundles_post_ra>
// kernel: tpu_custom_call.1
= control target key start
LH: loop header
LB: loop body
LE: loop exit
PB: predicated region body
PF: predicated region fallthrough
CT: control target
= control target key end

     0   :  { %6 = vsyncpa [#allocation3], 0  ;;  %s1071_s0 = inlined_call_operand.hbm [shape: f32[2,3,256,256], index: 0, kind: input, shape index: {}]   ;;  %s1072_s1 = inlined_call_operand.hbm [shape: f32[2,3,256,256], index: 1, kind: output, shape index: {}]  }
   0x1   :  { %8 = vsyncpa [#allocation3 + $0x1], 0 }
   0x2   :  { %9 = vsyncpa [#allocation4], 0 }
   0x3   :  { %11 = vsyncpa [#allocation4 + $0x1], 0  ;;  %s651_s6 = smov 0   ;;  %s653_s7 = smov 0  }
   0x4   :  { %s655_s8 = smov 0   ;;  %s657_s9 = smov 0  }
   0x5 LB: > { %s672_s10 = sadd.s32 4294967295, %s633_s9   ;;  %s478_s11 = sadd.s32 4294967294, %s633_s9   ;;  %s633_s9 = sphi %s657_s9, %s1087_s9   ;;  %s629_s8 = sphi %s655_s8, %s1086_s8   ;;  %s625_s7 = sphi %s653_s7, %s1085_s7   ;;  %s621_s6 = sphi %s651_s6, %s1084_s6  }
   0x6   : > { %s676_s12 = sadd.s32 1, %s633_s9   ;;  %s24_s13 = sadd.s32 1, %s629_s8 }
   0x7   : > { %s21_s14 = ssub.s32 %s633_s9, %s676_s12  ;;  %p31_p0 = scmp.ne.s32.totalorder %s629_s8, %s625_s7 }
   0x8   : > { %p22_p1 = scmp.eq.s32.totalorder %s21_s14, 0  ;;  %p32_p2 = scmp.eq.s32.totalorder %s633_s9, 0 }
   0x9   : > { %p37_p3 = scmp.ne.s32.totalorder %s625_s7, %s621_s6  ;;  %p38_p4 = scmp.eq.s32.totalorder %s672_s10, 0 }
   0xa   : > { %s688_s15 = scalar_select %p22_p1, %s629_s8, %s24_s13  }
   0xb   : > { %p690_p5 = por %p32_p2, %p31_p0  ;;  %p694_p6 = por %p38_p4, %p37_p3 }
   0xc   : > { %p61_p7 = scmp.eq.s32.totalorder %s672_s10, 1  ;;  %p67_p8 = scmp.eq.s32.totalorder %s478_s11, 1 }
   0xd   : > { %s1076_s17 = scalar_select %p694_p6, 1, 0 }
   0xe   : > { %p503_p10 = scmp.lt.s32.totalorder %s633_s9, 2  ;;  %p701_p11 = por %p61_p7, %p31_p0 }
   0xf   : > { %p705_p12 = por %p67_p8, %p37_p3  ;;  %s87_s20 = sand.u32 1, %s629_s8  }
  0x10   : > { %s1077_s18 = scalar_select %p701_p11, 1, 0 }
  0x11   : > { %s1078_s19 = scalar_select %p705_p12, 1, 0 }
  0x12   : > { %s488_s21 = smul.u32 24576, %s633_s9  ;;  %s481_s22 = sshll.u32 %s87_s20, 9 }
  0x13   : > { %s91_s26 = scalar_lea.vmem [#allocation2], %s481_s22  ;;  %p718_p13 = pnand %p503_p10, %p690_p5 }
  0x14   : > { %s714_s25 = scalar_lea.hbm %s1071_s0, %s488_s21  ;;  %s98_s27 = sshll.u32 %s91_s26, 4  ;;  %s722_s27 = int_to_ptr.vmem [resolvable:$true] %s98_s27 }
  0x15   : > { %s724_s29 = scalar_lea.sflag [#allocation3], %s87_s20  ;;  %s541_s30 = scalar_lea.hbm %s714_s25, 8192 }
  0x16   : > { %p542_p0 = scmp.ne.s32.totalorder %s714_s25, %s541_s30  ;;  %p543_p1 = pneg %p718_p13 }
  0x17   : > { %s546_s4 = scalar_lea.hbm %s1071_s0, 49152  ;;  %p547_p4 = scmp.lt.s32.totalorder %s714_s25, %s1071_s0 }
  0x18   : > { %p544_p2 = pnand %p543_p1, %p542_p0  ;;  %p548_p5 = scmp.lt.s32.totalorder %s546_s4, %s541_s30 }
  0x1a   : > { %p545_p3 = pneg %p544_p2  ;;  %p549_p7 = por %p548_p5, %p547_p4 }
  0x1c   : > { %p550_p8 = pnand %p549_p7, %p545_p3 }
  0x1e   : > { %553 = shalt.err (!%p550_p8)
}
  0x1f   : > { %s554_s13 = scalar_lea.vmem %s722_s27, 8192  ;;  %s635_s14 = smov [#allocation2]  }
  0x20   : > { %p555_p10 = scmp.ne.s32.totalorder %s722_s27, %s554_s13  ;;  %s559_s16 = sshll.u32 %s635_s14, 4  ;;  %s560_s16 = int_to_ptr.vmem [resolvable:$false] %s559_s16 }
  0x21   : > { %s561_s20 = scalar_lea.vmem %s560_s16, 16384  ;;  %p562_p2 = scmp.lt.s32.totalorder %s722_s27, %s560_s16 }
  0x22   : > { %p557_p9 = pnand %p555_p10, %p543_p1  ;;  %p563_p12 = scmp.lt.s32.totalorder %s561_s20, %s554_s13 }
  0x24   : > { %p558_p0 = pneg %p557_p9  ;;  %p564_p11 = por %p563_p12, %p562_p2 }
  0x26   : > { %p565_p6 = pnand %p564_p11, %p558_p0 }
  0x28   : > { %568 = shalt.err (!%p565_p6)
}
  0x29   : > { %s636_s21 = smov 256   ;;  %s637_s22 = smov 16  }
  0x2a   : > { %498 = dma.hbm_to_vmem [thread:$0]  (!%p718_p13), %s714_s25, 8192, %s722_s27, %s724_s29, %s636_s21, %s636_s21, %s637_s22  }
  0x2b   : > { %p483_p9 = scmp.ge.s32.totalorder %s633_s9, 1  ;;  %p106_p1 = scmp.lt.s32.totalorder %s633_s9, 3 }
  0x2d   : > { %p107_p3 = pnand %p483_p9, %p106_p1 }
  0x2e   : > { %s748_s23 = sand.u32 (!%p107_p3), 1, %s625_s7   ;;  %p1080_p6 = scmp.ne.s32.totalorder (!%p107_p3), %s1076_s17, 0 }
  0x2f   : > { %110 = sbr.rel (%p107_p3) target bundleno = 165 (0xa5), region = 24  ;;  %s484_s24 = sshll.u32 (!%p107_p3), %s748_s23, 9 }
  0x30   : > { %s113_s26 = scalar_lea.sflag (!%p107_p3), [#allocation3], %s748_s23  ;;  %s752_s30 = scalar_lea.vmem (!%p107_p3), [#allocation2], %s484_s24 }
  0x34   : > { %612 = dma.done.wait (%p1080_p6), %s113_s26, 8192  }
  0x35   : > { %614 = vsyncadd (%p1080_p6), %s113_s26, 4294959104  ;;  %s489_s25 = smul.u32 1536, %s748_s23  ;;  %v135_v0 = vld [vmem:[%s752_s30] sm:$0xff]  ;;  %v136_v1 = vld [vmem:[%s752_s30 + $0x8] sm:$0xff]  ;;  %p1081_p12 = scmp.ne.s32.totalorder %s1077_s18, 0 }
  0x36   : > { %v137_v2 = vld [vmem:[%s752_s30 + $0x10] sm:$0xff]  ;;  %v138_v3 = vld [vmem:[%s752_s30 + $0x18] sm:$0xff]  ;;  %v139_v4 = vld [vmem:[%s752_s30 + $0x20] sm:$0xff]  ;;  %s490_s17 = smul.u32 24576, %s672_s10  ;;  %s392_s10 = scalar_lea.sflag [#allocation4], %s748_s23 }
  0x37   : > { %s762_s27 = scalar_lea.vmem [#allocation5], %s489_s25  ;;  %v140_v5 = vld [vmem:[%s752_s30 + $0x28] sm:$0xff]  ;;  %v141_v6 = vld [vmem:[%s752_s30 + $0x30] sm:$0xff]  ;;  %v142_v7 = vld [vmem:[%s752_s30 + $0x38] sm:$0xff]  ;;  %s638_s5 = smov [#allocation5]  }
  0x38   : > { %199 = vst [vmem:[%s762_s27] sm:$0xff] %v135_v0  ;;  %263 = vst [vmem:[%s762_s27 + $0x200] sm:$0xff] %v135_v0  ;;  %v143_v8 = vld [vmem:[%s752_s30 + $0x40] sm:$0xff]  ;;  %v144_v9 = vld [vmem:[%s752_s30 + $0x48] sm:$0xff]  ;;  %s405_s28 = sshll.u32 %s762_s27, 4  ;;  %s1011_s3 = scalar_lea.hbm %s1072_s1, %s490_s17  ;;  %s1015_s28 = int_to_ptr.vmem [resolvable:$true] %s405_s28 }
  0x39   : > { %327 = vst [vmem:[%s762_s27 + $0x400] sm:$0xff] %v135_v0  ;;  %200 = vst [vmem:[%s762_s27 + $0x8] sm:$0xff] %v136_v1  ;;  %v145_v10 = vld [vmem:[%s752_s30 + $0x50] sm:$0xff]  ;;  %v146_v11 = vld [vmem:[%s752_s30 + $0x58] sm:$0xff]  ;;  %s569_s4 = scalar_lea.vmem %s1015_s28, 24576  ;;  %s573_s11 = sshll.u32 %s638_s5, 4  ;;  %s574_s11 = int_to_ptr.vmem [resolvable:$false] %s573_s11 }
  0x3a   : > { %264 = vst [vmem:[%s762_s27 + $0x208] sm:$0xff] %v136_v1  ;;  %328 = vst [vmem:[%s762_s27 + $0x408] sm:$0xff] %v136_v1  ;;  %v147_v12 = vld [vmem:[%s752_s30 + $0x60] sm:$0xff]  ;;  %v148_v13 = vld [vmem:[%s752_s30 + $0x68] sm:$0xff]  ;;  %p570_p11 = scmp.ne.s32.totalorder %s1015_s28, %s569_s4  ;;  %s575_s13 = scalar_lea.vmem %s574_s11, 49152 }
  0x3b   : > { %201 = vst [vmem:[%s762_s27 + $0x10] sm:$0xff] %v137_v2  ;;  %265 = vst [vmem:[%s762_s27 + $0x210] sm:$0xff] %v137_v2  ;;  %v149_v14 = vld [vmem:[%s752_s30 + $0x70] sm:$0xff]  ;;  %v150_v15 = vld [vmem:[%s752_s30 + $0x78] sm:$0xff]  ;;  %p576_p5 = scmp.lt.s32.totalorder %s1015_s28, %s574_s11  ;;  %p577_p7 = scmp.lt.s32.totalorder %s575_s13, %s569_s4 }
  0x3c   : > { %329 = vst [vmem:[%s762_s27 + $0x410] sm:$0xff] %v137_v2  ;;  %202 = vst [vmem:[%s762_s27 + $0x18] sm:$0xff] %v138_v3  ;;  %v151_v16 = vld [vmem:[%s752_s30 + $0x80] sm:$0xff]  ;;  %v152_v17 = vld [vmem:[%s752_s30 + $0x88] sm:$0xff]  ;;  %p571_p13 = pnand %p570_p11, %p1081_p12 }
  0x3d   : > { %266 = vst [vmem:[%s762_s27 + $0x218] sm:$0xff] %v138_v3  ;;  %330 = vst [vmem:[%s762_s27 + $0x418] sm:$0xff] %v138_v3  ;;  %v153_v18 = vld [vmem:[%s752_s30 + $0x90] sm:$0xff]  ;;  %v154_v19 = vld [vmem:[%s752_s30 + $0x98] sm:$0xff]  ;;  %p578_p8 = por %p577_p7, %p576_p5 }
  0x3e   : > { %203 = vst [vmem:[%s762_s27 + $0x20] sm:$0xff] %v139_v4  ;;  %267 = vst [vmem:[%s762_s27 + $0x220] sm:$0xff] %v139_v4  ;;  %v155_v20 = vld [vmem:[%s752_s30 + $0xa0] sm:$0xff]  ;;  %v156_v21 = vld [vmem:[%s752_s30 + $0xa8] sm:$0xff]  ;;  %p572_p4 = pneg %p571_p13 }
  0x3f   : > { %331 = vst [vmem:[%s762_s27 + $0x420] sm:$0xff] %v139_v4  ;;  %204 = vst [vmem:[%s762_s27 + $0x28] sm:$0xff] %v140_v5  ;;  %v157_v22 = vld [vmem:[%s752_s30 + $0xb0] sm:$0xff]  ;;  %v158_v23 = vld [vmem:[%s752_s30 + $0xb8] sm:$0xff] }
  0x40   : > { %268 = vst [vmem:[%s762_s27 + $0x228] sm:$0xff] %v140_v5  ;;  %332 = vst [vmem:[%s762_s27 + $0x428] sm:$0xff] %v140_v5  ;;  %v159_v24 = vld [vmem:[%s752_s30 + $0xc0] sm:$0xff]  ;;  %v160_v25 = vld [vmem:[%s752_s30 + $0xc8] sm:$0xff]  ;;  %p579_p10 = pnand %p578_p8, %p572_p4 }
  0x41   : > { %205 = vst [vmem:[%s762_s27 + $0x30] sm:$0xff] %v141_v6  ;;  %269 = vst [vmem:[%s762_s27 + $0x230] sm:$0xff] %v141_v6  ;;  %v161_v26 = vld [vmem:[%s752_s30 + $0xd0] sm:$0xff]  ;;  %v162_v27 = vld [vmem:[%s752_s30 + $0xd8] sm:$0xff] }
  0x42   : > { %333 = vst [vmem:[%s762_s27 + $0x430] sm:$0xff] %v141_v6  ;;  %206 = vst [vmem:[%s762_s27 + $0x38] sm:$0xff] %v142_v7  ;;  %v163_v28 = vld [vmem:[%s752_s30 + $0xe0] sm:$0xff]  ;;  %v164_v29 = vld [vmem:[%s752_s30 + $0xe8] sm:$0xff] }
  0x43   : > { %270 = vst [vmem:[%s762_s27 + $0x238] sm:$0xff] %v142_v7  ;;  %334 = vst [vmem:[%s762_s27 + $0x438] sm:$0xff] %v142_v7  ;;  %v165_v30 = vld [vmem:[%s752_s30 + $0xf0] sm:$0xff]  ;;  %v166_v31 = vld [vmem:[%s752_s30 + $0xf8] sm:$0xff] }
  0x44   : > { %207 = vst [vmem:[%s762_s27 + $0x40] sm:$0xff] %v143_v8  ;;  %271 = vst [vmem:[%s762_s27 + $0x240] sm:$0xff] %v143_v8  ;;  %v167_v32 = vld [vmem:[%s752_s30 + $0x100] sm:$0xff]  ;;  %v168_v33 = vld [vmem:[%s752_s30 + $0x108] sm:$0xff] }
  0x45   : > { %335 = vst [vmem:[%s762_s27 + $0x440] sm:$0xff] %v143_v8  ;;  %208 = vst [vmem:[%s762_s27 + $0x48] sm:$0xff] %v144_v9  ;;  %v169_v34 = vld [vmem:[%s752_s30 + $0x110] sm:$0xff]  ;;  %v170_v35 = vld [vmem:[%s752_s30 + $0x118] sm:$0xff] }
  0x46   : > { %272 = vst [vmem:[%s762_s27 + $0x248] sm:$0xff] %v144_v9  ;;  %336 = vst [vmem:[%s762_s27 + $0x448] sm:$0xff] %v144_v9  ;;  %v171_v36 = vld [vmem:[%s752_s30 + $0x120] sm:$0xff]  ;;  %v172_v37 = vld [vmem:[%s752_s30 + $0x128] sm:$0xff] }
  0x47   : > { %209 = vst [vmem:[%s762_s27 + $0x50] sm:$0xff] %v145_v10  ;;  %273 = vst [vmem:[%s762_s27 + $0x250] sm:$0xff] %v145_v10  ;;  %v173_v38 = vld [vmem:[%s752_s30 + $0x130] sm:$0xff]  ;;  %v174_v39 = vld [vmem:[%s752_s30 + $0x138] sm:$0xff] }
  0x48   : > { %337 = vst [vmem:[%s762_s27 + $0x450] sm:$0xff] %v145_v10  ;;  %210 = vst [vmem:[%s762_s27 + $0x58] sm:$0xff] %v146_v11  ;;  %v175_v40 = vld [vmem:[%s752_s30 + $0x140] sm:$0xff]  ;;  %v176_v41 = vld [vmem:[%s752_s30 + $0x148] sm:$0xff] }
  0x49   : > { %274 = vst [vmem:[%s762_s27 + $0x258] sm:$0xff] %v146_v11  ;;  %338 = vst [vmem:[%s762_s27 + $0x458] sm:$0xff] %v146_v11  ;;  %v177_v42 = vld [vmem:[%s752_s30 + $0x150] sm:$0xff]  ;;  %v178_v43 = vld [vmem:[%s752_s30 + $0x158] sm:$0xff] }
  0x4a   : > { %211 = vst [vmem:[%s762_s27 + $0x60] sm:$0xff] %v147_v12  ;;  %275 = vst [vmem:[%s762_s27 + $0x260] sm:$0xff] %v147_v12  ;;  %v179_v44 = vld [vmem:[%s752_s30 + $0x160] sm:$0xff]  ;;  %v180_v45 = vld [vmem:[%s752_s30 + $0x168] sm:$0xff] }
  0x4b   : > { %339 = vst [vmem:[%s762_s27 + $0x460] sm:$0xff] %v147_v12  ;;  %212 = vst [vmem:[%s762_s27 + $0x68] sm:$0xff] %v148_v13  ;;  %v181_v46 = vld [vmem:[%s752_s30 + $0x170] sm:$0xff]  ;;  %v182_v47 = vld [vmem:[%s752_s30 + $0x178] sm:$0xff] }
  0x4c   : > { %276 = vst [vmem:[%s762_s27 + $0x268] sm:$0xff] %v148_v13  ;;  %340 = vst [vmem:[%s762_s27 + $0x468] sm:$0xff] %v148_v13  ;;  %v183_v48 = vld [vmem:[%s752_s30 + $0x180] sm:$0xff]  ;;  %v184_v49 = vld [vmem:[%s752_s30 + $0x188] sm:$0xff] }
  0x4d   : > { %213 = vst [vmem:[%s762_s27 + $0x70] sm:$0xff] %v149_v14  ;;  %277 = vst [vmem:[%s762_s27 + $0x270] sm:$0xff] %v149_v14  ;;  %v185_v50 = vld [vmem:[%s752_s30 + $0x190] sm:$0xff]  ;;  %v186_v51 = vld [vmem:[%s752_s30 + $0x198] sm:$0xff] }
  0x4e   : > { %341 = vst [vmem:[%s762_s27 + $0x470] sm:$0xff] %v149_v14  ;;  %214 = vst [vmem:[%s762_s27 + $0x78] sm:$0xff] %v150_v15  ;;  %v187_v52 = vld [vmem:[%s752_s30 + $0x1a0] sm:$0xff]  ;;  %v188_v53 = vld [vmem:[%s752_s30 + $0x1a8] sm:$0xff] }
  0x4f   : > { %278 = vst [vmem:[%s762_s27 + $0x278] sm:$0xff] %v150_v15  ;;  %342 = vst [vmem:[%s762_s27 + $0x478] sm:$0xff] %v150_v15  ;;  %v189_v54 = vld [vmem:[%s752_s30 + $0x1b0] sm:$0xff]  ;;  %v190_v55 = vld [vmem:[%s752_s30 + $0x1b8] sm:$0xff] }
  0x50   : > { %215 = vst [vmem:[%s762_s27 + $0x80] sm:$0xff] %v151_v16  ;;  %279 = vst [vmem:[%s762_s27 + $0x280] sm:$0xff] %v151_v16  ;;  %v191_v56 = vld [vmem:[%s752_s30 + $0x1c0] sm:$0xff]  ;;  %v192_v57 = vld [vmem:[%s752_s30 + $0x1c8] sm:$0xff] }
  0x51   : > { %343 = vst [vmem:[%s762_s27 + $0x480] sm:$0xff] %v151_v16  ;;  %216 = vst [vmem:[%s762_s27 + $0x88] sm:$0xff] %v152_v17  ;;  %v193_v58 = vld [vmem:[%s752_s30 + $0x1d0] sm:$0xff]  ;;  %v194_v59 = vld [vmem:[%s752_s30 + $0x1d8] sm:$0xff] }
  0x52   : > { %280 = vst [vmem:[%s762_s27 + $0x288] sm:$0xff] %v152_v17  ;;  %344 = vst [vmem:[%s762_s27 + $0x488] sm:$0xff] %v152_v17  ;;  %v195_v60 = vld [vmem:[%s752_s30 + $0x1e0] sm:$0xff]  ;;  %v196_v61 = vld [vmem:[%s752_s30 + $0x1e8] sm:$0xff] }
  0x53   : > { %217 = vst [vmem:[%s762_s27 + $0x90] sm:$0xff] %v153_v18  ;;  %281 = vst [vmem:[%s762_s27 + $0x290] sm:$0xff] %v153_v18  ;;  %v197_v62 = vld [vmem:[%s752_s30 + $0x1f0] sm:$0xff]  ;;  %v198_v63 = vld [vmem:[%s752_s30 + $0x1f8] sm:$0xff] }
  0x54   : > { %345 = vst [vmem:[%s762_s27 + $0x490] sm:$0xff] %v153_v18  ;;  %218 = vst [vmem:[%s762_s27 + $0x98] sm:$0xff] %v154_v19 }
  0x55   : > { %282 = vst [vmem:[%s762_s27 + $0x298] sm:$0xff] %v154_v19  ;;  %346 = vst [vmem:[%s762_s27 + $0x498] sm:$0xff] %v154_v19 }
  0x56   : > { %219 = vst [vmem:[%s762_s27 + $0xa0] sm:$0xff] %v155_v20  ;;  %283 = vst [vmem:[%s762_s27 + $0x2a0] sm:$0xff] %v155_v20 }
  0x57   : > { %347 = vst [vmem:[%s762_s27 + $0x4a0] sm:$0xff] %v155_v20  ;;  %220 = vst [vmem:[%s762_s27 + $0xa8] sm:$0xff] %v156_v21 }
  0x58   : > { %284 = vst [vmem:[%s762_s27 + $0x2a8] sm:$0xff] %v156_v21  ;;  %348 = vst [vmem:[%s762_s27 + $0x4a8] sm:$0xff] %v156_v21 }
  0x59   : > { %221 = vst [vmem:[%s762_s27 + $0xb0] sm:$0xff] %v157_v22  ;;  %285 = vst [vmem:[%s762_s27 + $0x2b0] sm:$0xff] %v157_v22 }
  0x5a   : > { %349 = vst [vmem:[%s762_s27 + $0x4b0] sm:$0xff] %v157_v22  ;;  %222 = vst [vmem:[%s762_s27 + $0xb8] sm:$0xff] %v158_v23 }
  0x5b   : > { %286 = vst [vmem:[%s762_s27 + $0x2b8] sm:$0xff] %v158_v23  ;;  %350 = vst [vmem:[%s762_s27 + $0x4b8] sm:$0xff] %v158_v23 }
  0x5c   : > { %223 = vst [vmem:[%s762_s27 + $0xc0] sm:$0xff] %v159_v24  ;;  %287 = vst [vmem:[%s762_s27 + $0x2c0] sm:$0xff] %v159_v24 }
  0x5d   : > { %351 = vst [vmem:[%s762_s27 + $0x4c0] sm:$0xff] %v159_v24  ;;  %224 = vst [vmem:[%s762_s27 + $0xc8] sm:$0xff] %v160_v25 }
  0x5e   : > { %288 = vst [vmem:[%s762_s27 + $0x2c8] sm:$0xff] %v160_v25  ;;  %352 = vst [vmem:[%s762_s27 + $0x4c8] sm:$0xff] %v160_v25 }
  0x5f   : > { %225 = vst [vmem:[%s762_s27 + $0xd0] sm:$0xff] %v161_v26  ;;  %289 = vst [vmem:[%s762_s27 + $0x2d0] sm:$0xff] %v161_v26 }
  0x60   : > { %353 = vst [vmem:[%s762_s27 + $0x4d0] sm:$0xff] %v161_v26  ;;  %226 = vst [vmem:[%s762_s27 + $0xd8] sm:$0xff] %v162_v27 }
  0x61   : > { %290 = vst [vmem:[%s762_s27 + $0x2d8] sm:$0xff] %v162_v27  ;;  %354 = vst [vmem:[%s762_s27 + $0x4d8] sm:$0xff] %v162_v27 }
  0x62   : > { %227 = vst [vmem:[%s762_s27 + $0xe0] sm:$0xff] %v163_v28  ;;  %291 = vst [vmem:[%s762_s27 + $0x2e0] sm:$0xff] %v163_v28 }
  0x63   : > { %355 = vst [vmem:[%s762_s27 + $0x4e0] sm:$0xff] %v163_v28  ;;  %228 = vst [vmem:[%s762_s27 + $0xe8] sm:$0xff] %v164_v29 }
  0x64   : > { %292 = vst [vmem:[%s762_s27 + $0x2e8] sm:$0xff] %v164_v29  ;;  %356 = vst [vmem:[%s762_s27 + $0x4e8] sm:$0xff] %v164_v29 }
  0x65   : > { %229 = vst [vmem:[%s762_s27 + $0xf0] sm:$0xff] %v165_v30  ;;  %293 = vst [vmem:[%s762_s27 + $0x2f0] sm:$0xff] %v165_v30 }
  0x66   : > { %357 = vst [vmem:[%s762_s27 + $0x4f0] sm:$0xff] %v165_v30  ;;  %230 = vst [vmem:[%s762_s27 + $0xf8] sm:$0xff] %v166_v31 }
  0x67   : > { %294 = vst [vmem:[%s762_s27 + $0x2f8] sm:$0xff] %v166_v31  ;;  %358 = vst [vmem:[%s762_s27 + $0x4f8] sm:$0xff] %v166_v31 }
  0x68   : > { %231 = vst [vmem:[%s762_s27 + $0x100] sm:$0xff] %v167_v32  ;;  %295 = vst [vmem:[%s762_s27 + $0x300] sm:$0xff] %v167_v32 }
  0x69   : > { %359 = vst [vmem:[%s762_s27 + $0x500] sm:$0xff] %v167_v32  ;;  %232 = vst [vmem:[%s762_s27 + $0x108] sm:$0xff] %v168_v33 }
  0x6a   : > { %296 = vst [vmem:[%s762_s27 + $0x308] sm:$0xff] %v168_v33  ;;  %360 = vst [vmem:[%s762_s27 + $0x508] sm:$0xff] %v168_v33 }
  0x6b   : > { %233 = vst [vmem:[%s762_s27 + $0x110] sm:$0xff] %v169_v34  ;;  %297 = vst [vmem:[%s762_s27 + $0x310] sm:$0xff] %v169_v34 }
  0x6c   : > { %361 = vst [vmem:[%s762_s27 + $0x510] sm:$0xff] %v169_v34  ;;  %234 = vst [vmem:[%s762_s27 + $0x118] sm:$0xff] %v170_v35 }
  0x6d   : > { %298 = vst [vmem:[%s762_s27 + $0x318] sm:$0xff] %v170_v35  ;;  %362 = vst [vmem:[%s762_s27 + $0x518] sm:$0xff] %v170_v35 }
  0x6e   : > { %235 = vst [vmem:[%s762_s27 + $0x120] sm:$0xff] %v171_v36  ;;  %299 = vst [vmem:[%s762_s27 + $0x320] sm:$0xff] %v171_v36 }
  0x6f   : > { %363 = vst [vmem:[%s762_s27 + $0x520] sm:$0xff] %v171_v36  ;;  %236 = vst [vmem:[%s762_s27 + $0x128] sm:$0xff] %v172_v37 }
  0x70   : > { %300 = vst [vmem:[%s762_s27 + $0x328] sm:$0xff] %v172_v37  ;;  %364 = vst [vmem:[%s762_s27 + $0x528] sm:$0xff] %v172_v37 }
  0x71   : > { %237 = vst [vmem:[%s762_s27 + $0x130] sm:$0xff] %v173_v38  ;;  %301 = vst [vmem:[%s762_s27 + $0x330] sm:$0xff] %v173_v38 }
  0x72   : > { %365 = vst [vmem:[%s762_s27 + $0x530] sm:$0xff] %v173_v38  ;;  %238 = vst [vmem:[%s762_s27 + $0x138] sm:$0xff] %v174_v39 }
  0x73   : > { %302 = vst [vmem:[%s762_s27 + $0x338] sm:$0xff] %v174_v39  ;;  %366 = vst [vmem:[%s762_s27 + $0x538] sm:$0xff] %v174_v39 }
  0x74   : > { %239 = vst [vmem:[%s762_s27 + $0x140] sm:$0xff] %v175_v40  ;;  %303 = vst [vmem:[%s762_s27 + $0x340] sm:$0xff] %v175_v40 }
  0x75   : > { %367 = vst [vmem:[%s762_s27 + $0x540] sm:$0xff] %v175_v40  ;;  %240 = vst [vmem:[%s762_s27 + $0x148] sm:$0xff] %v176_v41 }
  0x76   : > { %304 = vst [vmem:[%s762_s27 + $0x348] sm:$0xff] %v176_v41  ;;  %368 = vst [vmem:[%s762_s27 + $0x548] sm:$0xff] %v176_v41 }
  0x77   : > { %241 = vst [vmem:[%s762_s27 + $0x150] sm:$0xff] %v177_v42  ;;  %305 = vst [vmem:[%s762_s27 + $0x350] sm:$0xff] %v177_v42 }
  0x78   : > { %369 = vst [vmem:[%s762_s27 + $0x550] sm:$0xff] %v177_v42  ;;  %242 = vst [vmem:[%s762_s27 + $0x158] sm:$0xff] %v178_v43 }
  0x79   : > { %306 = vst [vmem:[%s762_s27 + $0x358] sm:$0xff] %v178_v43  ;;  %370 = vst [vmem:[%s762_s27 + $0x558] sm:$0xff] %v178_v43 }
  0x7a   : > { %243 = vst [vmem:[%s762_s27 + $0x160] sm:$0xff] %v179_v44  ;;  %307 = vst [vmem:[%s762_s27 + $0x360] sm:$0xff] %v179_v44 }
  0x7b   : > { %371 = vst [vmem:[%s762_s27 + $0x560] sm:$0xff] %v179_v44  ;;  %244 = vst [vmem:[%s762_s27 + $0x168] sm:$0xff] %v180_v45 }
  0x7c   : > { %308 = vst [vmem:[%s762_s27 + $0x368] sm:$0xff] %v180_v45  ;;  %372 = vst [vmem:[%s762_s27 + $0x568] sm:$0xff] %v180_v45 }
  0x7d   : > { %245 = vst [vmem:[%s762_s27 + $0x170] sm:$0xff] %v181_v46  ;;  %309 = vst [vmem:[%s762_s27 + $0x370] sm:$0xff] %v181_v46 }
  0x7e   : > { %373 = vst [vmem:[%s762_s27 + $0x570] sm:$0xff] %v181_v46  ;;  %246 = vst [vmem:[%s762_s27 + $0x178] sm:$0xff] %v182_v47 }
  0x7f   : > { %310 = vst [vmem:[%s762_s27 + $0x378] sm:$0xff] %v182_v47  ;;  %374 = vst [vmem:[%s762_s27 + $0x578] sm:$0xff] %v182_v47 }
  0x80   : > { %247 = vst [vmem:[%s762_s27 + $0x180] sm:$0xff] %v183_v48  ;;  %311 = vst [vmem:[%s762_s27 + $0x380] sm:$0xff] %v183_v48 }
  0x81   : > { %375 = vst [vmem:[%s762_s27 + $0x580] sm:$0xff] %v183_v48  ;;  %248 = vst [vmem:[%s762_s27 + $0x188] sm:$0xff] %v184_v49 }
  0x82   : > { %312 = vst [vmem:[%s762_s27 + $0x388] sm:$0xff] %v184_v49  ;;  %376 = vst [vmem:[%s762_s27 + $0x588] sm:$0xff] %v184_v49 }
  0x83   : > { %249 = vst [vmem:[%s762_s27 + $0x190] sm:$0xff] %v185_v50  ;;  %313 = vst [vmem:[%s762_s27 + $0x390] sm:$0xff] %v185_v50 }
  0x84   : > { %377 = vst [vmem:[%s762_s27 + $0x590] sm:$0xff] %v185_v50  ;;  %250 = vst [vmem:[%s762_s27 + $0x198] sm:$0xff] %v186_v51 }
  0x85   : > { %314 = vst [vmem:[%s762_s27 + $0x398] sm:$0xff] %v186_v51  ;;  %378 = vst [vmem:[%s762_s27 + $0x598] sm:$0xff] %v186_v51 }
  0x86   : > { %251 = vst [vmem:[%s762_s27 + $0x1a0] sm:$0xff] %v187_v52  ;;  %315 = vst [vmem:[%s762_s27 + $0x3a0] sm:$0xff] %v187_v52 }
  0x87   : > { %379 = vst [vmem:[%s762_s27 + $0x5a0] sm:$0xff] %v187_v52  ;;  %252 = vst [vmem:[%s762_s27 + $0x1a8] sm:$0xff] %v188_v53 }
  0x88   : > { %316 = vst [vmem:[%s762_s27 + $0x3a8] sm:$0xff] %v188_v53  ;;  %380 = vst [vmem:[%s762_s27 + $0x5a8] sm:$0xff] %v188_v53 }
  0x89   : > { %253 = vst [vmem:[%s762_s27 + $0x1b0] sm:$0xff] %v189_v54  ;;  %317 = vst [vmem:[%s762_s27 + $0x3b0] sm:$0xff] %v189_v54 }
  0x8a   : > { %381 = vst [vmem:[%s762_s27 + $0x5b0] sm:$0xff] %v189_v54  ;;  %254 = vst [vmem:[%s762_s27 + $0x1b8] sm:$0xff] %v190_v55 }
  0x8b   : > { %318 = vst [vmem:[%s762_s27 + $0x3b8] sm:$0xff] %v190_v55  ;;  %382 = vst [vmem:[%s762_s27 + $0x5b8] sm:$0xff] %v190_v55 }
  0x8c   : > { %255 = vst [vmem:[%s762_s27 + $0x1c0] sm:$0xff] %v191_v56  ;;  %319 = vst [vmem:[%s762_s27 + $0x3c0] sm:$0xff] %v191_v56 }
  0x8d   : > { %383 = vst [vmem:[%s762_s27 + $0x5c0] sm:$0xff] %v191_v56  ;;  %256 = vst [vmem:[%s762_s27 + $0x1c8] sm:$0xff] %v192_v57 }
  0x8e   : > { %320 = vst [vmem:[%s762_s27 + $0x3c8] sm:$0xff] %v192_v57  ;;  %384 = vst [vmem:[%s762_s27 + $0x5c8] sm:$0xff] %v192_v57 }
  0x8f   : > { %257 = vst [vmem:[%s762_s27 + $0x1d0] sm:$0xff] %v193_v58  ;;  %321 = vst [vmem:[%s762_s27 + $0x3d0] sm:$0xff] %v193_v58 }
  0x90   : > { %385 = vst [vmem:[%s762_s27 + $0x5d0] sm:$0xff] %v193_v58  ;;  %258 = vst [vmem:[%s762_s27 + $0x1d8] sm:$0xff] %v194_v59 }
  0x91   : > { %322 = vst [vmem:[%s762_s27 + $0x3d8] sm:$0xff] %v194_v59  ;;  %386 = vst [vmem:[%s762_s27 + $0x5d8] sm:$0xff] %v194_v59 }
  0x92   : > { %259 = vst [vmem:[%s762_s27 + $0x1e0] sm:$0xff] %v195_v60  ;;  %323 = vst [vmem:[%s762_s27 + $0x3e0] sm:$0xff] %v195_v60 }
  0x93   : > { %387 = vst [vmem:[%s762_s27 + $0x5e0] sm:$0xff] %v195_v60  ;;  %260 = vst [vmem:[%s762_s27 + $0x1e8] sm:$0xff] %v196_v61 }
  0x94   : > { %324 = vst [vmem:[%s762_s27 + $0x3e8] sm:$0xff] %v196_v61  ;;  %388 = vst [vmem:[%s762_s27 + $0x5e8] sm:$0xff] %v196_v61 }
  0x95   : > { %261 = vst [vmem:[%s762_s27 + $0x1f0] sm:$0xff] %v197_v62  ;;  %325 = vst [vmem:[%s762_s27 + $0x3f0] sm:$0xff] %v197_v62 }
  0x96   : > { %389 = vst [vmem:[%s762_s27 + $0x5f0] sm:$0xff] %v197_v62  ;;  %262 = vst [vmem:[%s762_s27 + $0x1f8] sm:$0xff] %v198_v63 }
  0x97   : > { %326 = vst [vmem:[%s762_s27 + $0x3f8] sm:$0xff] %v198_v63  ;;  %390 = vst [vmem:[%s762_s27 + $0x5f8] sm:$0xff] %v198_v63 }
  0x98   : > { %582 = shalt.err (!%p579_p10)
}
  0x99   : > { %s583_s14 = scalar_lea.hbm %s1011_s3, 24576  ;;  %s587_s21 = scalar_lea.hbm %s1072_s1, 49152 }
  0x9a   : > { %p584_p0 = scmp.ne.s32.totalorder %s1011_s3, %s583_s14  ;;  %p588_p1 = scmp.lt.s32.totalorder %s1011_s3, %s1072_s1 }
  0x9b   : > { %p589_p3 = scmp.lt.s32.totalorder %s587_s21, %s583_s14 }
  0x9c   : > { %p585_p2 = pnand %p584_p0, %p1081_p12 }
  0x9d   : > { %p590_p6 = por %p589_p3, %p588_p1 }
  0x9e   : > { %p586_p9 = pneg %p585_p2 }
  0xa0   : > { %p591_p11 = pnand %p590_p6, %p586_p9 }
  0xa2   : > { %594 = shalt.err (!%p591_p11)
}
  0xa3   : > { %s639_s26 = smov 256   ;;  %s640_s30 = smov 16  }
  0xa4   : > { %493 = dma.vmem_to_hbm [thread:$0]  (%p1081_p12), %s1015_s28, 24576, %s1011_s3, %s392_s10, %s639_s26, %s639_s26, %s640_s30  }
  0xa5 PF: > { %s420_s25 = sand.u32 1, %s621_s6   ;;  %p1082_p13 = scmp.ne.s32.totalorder %s1078_s19, 0 }
  0xa6   : > { %p1083_p4 = scmp.ge.s32.totalorder %s633_s9, 2  ;;  %s421_s27 = scalar_lea.sflag [#allocation4], %s420_s25 }
  0xa8   : > { %p500_p5 = pnand %p1083_p4, %p1082_p13 }
  0xaa   : > { %p501_p7 = pneg %p500_p5 }
  0xac   : > { %616 = dma.done.wait (%p501_p7), %s421_s27, 24576  }
  0xad   : > { %618 = vsyncadd (%p501_p7), %s421_s27, 4294942720  ;;  %p14_p8 = scmp.ge.s32.totalorder %s676_s12, 4   ;;  %s1084_s6 = smov %s625_s7 }
  0xae   : > { %s1085_s7 = smov %s629_s8  ;;  %s1086_s8 = smov %s688_s15 }
  0xaf   : > { %s1087_s9 = smov %s676_s12  ;;  %16 = sbr.rel (!%p14_p8) target bundleno = 5 (0x5), region = 69 }
  0xb4   :  { %426 = vsyncpa [#allocation3], 1 }
  0xb5   :  { %428 = vsyncpa [#allocation3 + $0x1], 1 }
  0xb6   :  { %429 = vsyncpa [#allocation4], 1 }
  0xb7   :  { %431 = vsyncpa [#allocation4 + $0x1], 1 }

</bundles_post_ra>
